<compile_context>
chip_gen: v7x
topology: tpu7x:2x2x1
jax: 0.10.0
libtpu: 0.0.40
codegen_flags: <defaults>
</compile_context>

<pallas_src>
import functools

import numpy as np
import jax
import jax.numpy as jnp
from jax.experimental import pallas as pl
from jax.experimental.pallas import tpu as pltpu


def _intensity_kernel(x_ref, r_ref, o_ref, *, scale):
    """x_ref/o_ref: VMEM (bt, ft) image tile; r_ref: VMEM (bt, 1) f32 gaussians."""
    noise = 1.0 + scale * jnp.clip(r_ref[...], -2.0, 2.0)            # (bt, 1) f32
    # Multiply in f32 (PyTorch promotes the product); cast only the result.
    o_ref[...] = (x_ref[...].astype(jnp.float32) * noise).astype(o_ref.dtype)


def _choose_tiles(B, F, itemsize):
    """Pick (batch_tile, feature_tile) for ~2 MiB blocks on all TPU gens."""
    sub = max(1, 32 // itemsize)          # sublane packing: 8 f32, 16 bf16, 32 i8
    budget = 2 << 20                      # ~2 MiB / block: safe on v5e/v6e/v7x

    # Feature tile: whole F when a (sub, F) slab fits the budget, otherwise a
    # lane-multiple (128) chunk so double-buffered in+out blocks stay small.
    if F * itemsize * sub <= budget or F <= 128:
        ft = F
    else:
        ft = min(F, max(128, (budget // (sub * itemsize * 128)) * 128))

    # Batch tile: fill the budget, rounded to the dtype's sublane packing.
    bt = budget // max(1, ft * itemsize)
    bt = max(sub, (bt // sub) * sub)
    if bt >= B:
        bt = B                            # full-extent batch dim (always legal)
        # v7x has two TensorCores: if a large batch collapsed into a single
        # grid step, split it so the "parallel" axis can shard across cores.
        # No-op for tiny batches and on single-TC v5e/v6e.
        if F <= ft and B >= 2 * sub:
            half = -(-((B + 1) // 2) // sub) * sub    # round_up(ceil(B/2), sub)
            if half < B:
                bt = half
    return bt, ft


@functools.partial(jax.jit, static_argnames=("scale",))
def intensity(x, r, *, scale):
    """x: (B, C, H, W); r: (B,) standard-normal draws.  Returns x * noise."""
    B = x.shape[0]
    F = 1
    for d in x.shape[1:]:
        F *= int(d)

    xf = x.reshape(B, F)                       # lane-dense view (free reshape)
    rf = r.reshape(B, 1).astype(jnp.float32)

    bt, ft = _choose_tiles(B, F, xf.dtype.itemsize)
    grid = (pl.cdiv(B, bt), pl.cdiv(F, ft))    # ragged last blocks are masked

    out = pl.pallas_call(
        functools.partial(_intensity_kernel, scale=scale),
        out_shape=jax.ShapeDtypeStruct((B, F), x.dtype),
        grid_spec=pl.GridSpec(
            grid=grid,
            in_specs=[
                pl.BlockSpec((bt, ft), lambda i, j: (i, j)),
                pl.BlockSpec((bt, 1), lambda i, j: (i, 0)),
            ],
            out_specs=pl.BlockSpec((bt, ft), lambda i, j: (i, j)),
        ),
        compiler_params=pltpu.CompilerParams(
            dimension_semantics=("parallel", "parallel"),
        ),
    )(xf, rf)
    return out.reshape(x.shape)


def _reference(x, r, scale):
    noise = 1.0 + scale * jnp.clip(r, -2.0, 2.0)
    return (x.astype(jnp.float32) * noise.reshape(-1, 1, 1, 1)).astype(x.dtype)


if __name__ == "__main__":
    SCALE = 0.05
    B, C, H, W = 2, 4, 16, 16

    key = jax.random.PRNGKey(0)
    kx, kr = jax.random.split(key)
    x = jax.random.normal(kx, (B, C, H, W), dtype=jnp.float32)

    # torch.randn((B, 1, 1, 1)) equivalent.
    # TODO(synk): the PyTorch module draws the gaussian inside forward(); here
    # the draw happens in plain JAX and is passed in (no in-kernel PRNG needed).
    r = jax.random.normal(kr, (B,), dtype=jnp.float32)

    out = intensity(x, r, scale=SCALE)
    out = jax.block_until_ready(out)

    ref = _reference(x, r, SCALE)
    np.testing.assert_allclose(np.asarray(out), np.asarray(ref),
                               rtol=1e-6, atol=1e-6)

    print("KERNEL_OK")
</pallas_src>

<mosaic_0001>
module attributes {stable_mosaic.version = 11 : i64} {
  func.func @_intensity_kernel(%arg0: i32, %arg1: i32, %arg2: memref<2x1024xf32, #tpu.memory_space<vmem>>, %arg3: memref<2x1xf32, #tpu.memory_space<vmem>>, %arg4: memref<2x1024xf32, #tpu.memory_space<vmem>>) attributes {dimension_semantics = [#tpu.dimension_semantics<parallel>, #tpu.dimension_semantics<parallel>], iteration_bounds = array<i64: 1, 1>, scalar_prefetch = 0 : i64, scratch_operands = 0 : i64, tpu.core_type = #tpu.core_type<tc>, window_params = [{transform_indices = @transform_0, window_bounds = array<i64: 2, 1024>}, {transform_indices = @transform_1, window_bounds = array<i64: 2, 1>}, {transform_indices = @transform_2, window_bounds = array<i64: 2, 1024>}]} {
    %c0 = arith.constant 0 : index
    %c0_0 = arith.constant 0 : index
    %0 = vector.load %arg3[%c0, %c0_0] : memref<2x1xf32, #tpu.memory_space<vmem>>, vector<2x1xf32>
    %cst = arith.constant -2.000000e+00 : f32
    %cst_1 = arith.constant 2.000000e+00 : f32
    %1 = vector.broadcast %cst : f32 to vector<2x1xf32>
    %2 = arith.maximumf %1, %0 : vector<2x1xf32>
    %3 = vector.broadcast %cst_1 : f32 to vector<2x1xf32>
    %4 = arith.minimumf %3, %2 : vector<2x1xf32>
    %cst_2 = arith.constant 5.000000e-02 : f32
    %5 = vector.broadcast %cst_2 : f32 to vector<2x1xf32>
    %6 = arith.mulf %5, %4 : vector<2x1xf32>
    %cst_3 = arith.constant 1.000000e+00 : f32
    %7 = vector.broadcast %cst_3 : f32 to vector<2x1xf32>
    %8 = arith.addf %7, %6 : vector<2x1xf32>
    %c0_4 = arith.constant 0 : index
    %c0_5 = arith.constant 0 : index
    %9 = vector.load %arg2[%c0_4, %c0_5] : memref<2x1024xf32, #tpu.memory_space<vmem>>, vector<2x1024xf32>
    %10 = vector.broadcast %8 : vector<2x1xf32> to vector<2x1024xf32>
    %11 = arith.mulf %9, %10 : vector<2x1024xf32>
    %c0_6 = arith.constant 0 : index
    %c0_7 = arith.constant 0 : index
    %12 = vector.load %arg4[%c0_6, %c0_7] : memref<2x1024xf32, #tpu.memory_space<vmem>>, vector<2x1024xf32>
    tpu.vector_store %arg4[%c0_6, %c0_7], %11 {strides = array<i32>} : memref<2x1024xf32, #tpu.memory_space<vmem>>, vector<2x1024xf32>,
    return
  }
  func.func @transform_0(%arg0: i32, %arg1: i32) -> (i32, i32) {
    %c0_i32 = arith.constant 0 : i32
    return %arg0, %arg1 : i32, i32
  }
  func.func @transform_1(%arg0: i32, %arg1: i32) -> (i32, i32) {
    %c0_i32 = arith.constant 0 : i32
    %c0_i32_0 = arith.constant 0 : i32
    return %arg0, %c0_i32 : i32, i32
  }
  func.func @transform_2(%arg0: i32, %arg1: i32) -> (i32, i32) {
    %c0_i32 = arith.constant 0 : i32
    return %arg0, %arg1 : i32, i32
  }
}

</mosaic_0001>

<bundles_post_ra>
// kernel: intensity.1
= control target key start
LH: loop header
LB: loop body
LE: loop exit
PB: predicated region body
PF: predicated region fallthrough
CT: control target
= control target key end

     0   :  { %v42_v0 = vmov 0   ;;  %v43_v5 = vmov 269488144   ;;  %v25_v7 = vlaneseq  ;;  %s74_s1 = inlined_call_operand.vmem [shape: f32[2,1], index: 1, kind: input, shape index: {}]   ;;  %s75_s0 = inlined_call_operand.vmem [shape: f32[2,1024], index: 0, kind: input, shape index: {}]   ;;  %s76_s2 = inlined_call_operand.vmem [shape: f32[2,1024], index: 2, kind: output, shape index: {}]  }
   0x1   :  { %41 = vset.pattern.permute.xlu0 %v42_v0  ;;  %v11_v1 = vld [vmem:[%s74_s1] sm:$0x3]  ;;  %v23_v6 = vunpack.c.l.s4 %v43_v5  ;;  %v17_v13 = vld [vmem:[%s75_s0 + $0x8] sm:$0xff] }
   0x2   :  { %v38_v2 = vclamps-f32 %v11_v1, 2.0  ;;  %v26_v9 = vshrl.u32 %v25_v7, 7  ;;  %v16_v12 = vld [vmem:[%s75_s0] sm:$0xff] }
   0x3   :  { %v24_v8 = vunpack.c.0.s8 %v23_v6 }
   0x4   :  { %v14_v3 = vmul.f32 0.05, %v38_v2 }
   0x5   :  { %v27_v10 = vsub.s32 %v24_v8, %v26_v9 }
   0x6   :  { %v15_v4 = vadd.f32 1.0, %v14_v3 }
   0x8   :  { %20 = vperm.xlu0 %41, %v15_v4  }
  0x87   :  { %v21_v11 = vpop.permute.xlu0 %20 }
  0x88   :  { %v28_v14 = vrot.slane %v21_v11, %v27_v10 }
  0x8a   :  { %v30_v15 = vmul.f32 %v28_v14, %v16_v12  ;;  %v31_v16 = vmul.f32 %v28_v14, %v17_v13 }
  0x8c   :  { %32 = vst [vmem:[%s76_s2] sm:$0xff] %v30_v15  ;;  %33 = vst [vmem:[%s76_s2 + $0x8] sm:$0xff] %v31_v16 }

</bundles_post_ra>
